<compile_context>
chip_gen: v5e
topology: v5e:2x2
jax: 0.10.0
libtpu: 0.0.40
codegen_flags: <defaults>
</compile_context>

<pallas_src>
import functools
import math

import numpy as np
import jax
import jax.numpy as jnp
from jax import lax
from jax.experimental import pallas as pl
from jax.experimental.pallas import tpu as pltpu


def _penc_packed_kernel(params_ref, out_ref, *, pos_per_period: int):
    """Lane-dense path.  out_ref: (rows, 128) tile of the flattened (S*C,) table.

    params_ref: (3, period, 128) f32 --
        [0]: inv_freq per (period-row, lane)
        [1]: phase per (period-row, lane)      (0 for sin lanes, pi/2 for cos lanes)
        [2]: position offset per (period-row, lane)   ( = flat_index // C within one period )
    The pattern repeats every `period` rows; each period advances the position by pos_per_period.
    """
    rows, lanes = out_ref.shape
    period = params_ref.shape[1]
    groups = rows // period                      # row_tile is always a multiple of `period`

    base = (pl.program_id(0) * (groups * pos_per_period)).astype(jnp.float32)
    grp = lax.broadcasted_iota(jnp.int32, (groups, period, lanes), 0).astype(jnp.float32)
    pos = base + grp * jnp.float32(pos_per_period) + params_ref[2][None, :, :]
    angle = pos * params_ref[0][None, :, :] + params_ref[1][None, :, :]
    # period is a multiple of the sublane packing, so this reshape is layout-trivial.
    out_ref[...] = jnp.sin(angle).reshape(rows, lanes).astype(out_ref.dtype)


def _penc_rows_kernel(params_ref, out_ref):
    """Natural-layout path.  out_ref: (rows, C_out) tile, one sequence position per row.

    params_ref: (2, C_out) f32 -- [0]: inv_freq per lane, [1]: phase per lane.
    """
    rows, w = out_ref.shape
    base = (pl.program_id(0) * rows).astype(jnp.float32)
    pos = base + lax.broadcasted_iota(jnp.int32, (rows, w), 0).astype(jnp.float32)
    angle = pos * params_ref[0:1, :] + params_ref[1:2, :]
    out_ref[...] = jnp.sin(angle).astype(out_ref.dtype)


def _choose_row_tile(total_rows: int, unit: int, width: int, elem_bytes: int,
                     target_bytes: int = 8 * 1024 * 1024) -> int:
    """Row tile: a multiple of `unit` capped at ~target_bytes.  Never returns an unbounded
    full-extent block, and splits large one-tile tables in two so both v7x TensorCores get
    work on the "parallel" row axis."""
    bytes_per_row = max(width * elem_bytes, 1)
    cap = max(unit, (target_bytes // bytes_per_row) // unit * unit)
    if total_rows <= unit:
        return total_rows                       # tiny table: single full-extent block
    tile = min(cap, (total_rows // unit) * unit)
    # Fits in one tile but is big enough to be worth sharing across two TensorCores -> halve.
    if tile * bytes_per_row >= 2 * 1024 * 1024 and pl.cdiv(total_rows, tile) == 1:
        half = pl.cdiv(total_rows, 2)
        tile = min(tile, pl.cdiv(half, unit) * unit)
    return tile


def positional_encoding_1d(x: jax.Array, org_channels: int | None = None) -> jax.Array:
    """Pallas equivalent of PositionalEncoding1D(channels)(x) for a 3-D input (B, S, C)."""
    if x.ndim != 3:
        raise RuntimeError("The input tensor has to be 3d!")
    batch, seq, orig_ch = x.shape
    if org_channels is None:
        org_channels = orig_ch
    channels = int(np.ceil(org_channels / 2) * 2)
    out_dtype = x.dtype
    elem_bytes = jnp.dtype(out_dtype).itemsize
    sub_mult = {4: 8, 2: 16, 1: 32}.get(elem_bytes, 8)   # sublane packing for the out dtype

    def lane_tables(c):
        c = np.asarray(c)
        # inv_freq[c//2] = 10000 ** (-(2*(c//2)) / channels); even c -> sin, odd c -> cos(=sin+pi/2)
        inv_freq = (10000.0 ** (-(c - (c % 2)).astype(np.float64) / channels)).astype(np.float32)
        phase = (c % 2).astype(np.float32) * np.float32(np.pi / 2.0)
        return inv_freq, phase

    # Lane-dense packed layout: flatten (S, C) -> (S*C/128, 128).  Valid for any even C
    # (== org_channels) whose flattened table fills whole 128-lane rows.  C % 128 == 0 is
    # already lane-dense in the natural layout, so it stays on the simpler path.
    L = channels // math.gcd(channels, 128)
    period = (L * sub_mult) // math.gcd(L, sub_mult)      # lcm(L, sublane packing)
    flat = seq * channels
    packed = (
        orig_ch == channels
        and channels % 128 != 0
        and flat % 128 == 0
        and flat // 128 >= period
    )

    if packed:
        width = 128
        total_rows = flat // 128
        unit = period
        f = np.arange(period * 128).reshape(period, 128)  # flat index within one period
        inv_freq, phase = lane_tables(f % channels)
        posoff = (f // channels).astype(np.float32)
        params = jnp.asarray(np.stack([inv_freq, phase, posoff], axis=0))   # (3, period, 128)
        pos_per_period = period * 128 // channels
        kernel = functools.partial(_penc_packed_kernel, pos_per_period=pos_per_period)
        in_spec = pl.BlockSpec(params.shape, lambda r: (0, 0, 0))
    else:
        width = orig_ch            # emit only the returned columns (no post-kernel slice copy)
        total_rows = seq
        unit = sub_mult
        inv_freq, phase = lane_tables(np.arange(orig_ch))
        params = jnp.asarray(np.stack([inv_freq, phase], axis=0))           # (2, orig_ch)
        kernel = _penc_rows_kernel
        in_spec = pl.BlockSpec(params.shape, lambda r: (0, 0))

    row_tile = _choose_row_tile(total_rows, unit, width, elem_bytes)
    grid = (pl.cdiv(total_rows, row_tile),)

    table = pl.pallas_call(
        kernel,
        out_shape=jax.ShapeDtypeStruct((total_rows, width), out_dtype),
        grid_spec=pltpu.PrefetchScalarGridSpec(
            num_scalar_prefetch=0,
            grid=grid,
            in_specs=[in_spec],
            out_specs=pl.BlockSpec((row_tile, width), lambda r: (r, 0)),
        ),
        compiler_params=pltpu.CompilerParams(
            # Row tiles are independent -> "parallel" (v7x megacore).  No batch axis: the table
            # is batch-invariant and broadcast in the wrapper below instead of rewritten B times.
            dimension_semantics=("parallel",),
            # 2 double-buffered ~8 MiB output blocks + tiny params: well under this limit on
            # v5e/v6e (128 MiB physical) and v7x (64 MiB physical).
            vmem_limit_bytes=48 * 1024 * 1024,
        ),
    )(params)

    if packed:
        table = table.reshape(seq, channels)          # contiguous, layout-preserving
    # Batch-invariant: broadcast lazily instead of materializing B copies from the kernel.
    return jnp.broadcast_to(table[None, :, :], (batch, seq, orig_ch))


def _reference(x: np.ndarray, org_channels: int | None = None) -> np.ndarray:
    batch, seq, orig_ch = x.shape
    if org_channels is None:
        org_channels = orig_ch
    channels = int(np.ceil(org_channels / 2) * 2)
    inv_freq = (10000.0 ** (-(np.arange(0, channels, 2, dtype=np.float64)) / channels)).astype(np.float32)
    pos = np.arange(seq, dtype=np.float32)
    sin_inp = np.einsum("i,j->ij", pos, inv_freq)
    emb = np.stack((np.sin(sin_inp), np.cos(sin_inp)), axis=-1).reshape(seq, channels)
    return np.broadcast_to(emb[None, :, :orig_ch], (batch, seq, orig_ch)).astype(x.dtype)


if __name__ == "__main__":
    key = jax.random.PRNGKey(0)

    tests = [
        ((2, 16, 8), jnp.float32),     # tiny table, natural layout
        ((2, 20, 10), jnp.float32),    # natural layout, ragged last row tile
        ((2, 16, 7), jnp.float32),     # odd channel count (padded to 8, only 7 emitted)
        ((2, 128, 32), jnp.float32),   # lane-dense packed path (C divides 128)
        ((2, 256, 24), jnp.float32),   # lane-dense packed path, C does not divide 128 (period 24)
        ((2, 100, 32), jnp.float32),   # packed path with a ragged last row tile
        ((2, 64, 32), jnp.bfloat16),   # bf16 output (16-row sublane packing)
    ]

    for shape, dtype in tests:
        x = jax.random.normal(key, shape, dtype=jnp.float32).astype(dtype)
        out = jax.block_until_ready(positional_encoding_1d(x))
        ref = _reference(np.asarray(x, dtype=np.float32).astype(np.float32).reshape(shape))
        ref = ref.astype(np.asarray(out).dtype)
        tol = 2e-2 if dtype == jnp.bfloat16 else 1e-4
        np.testing.assert_allclose(
            np.asarray(out, dtype=np.float32), ref.astype(np.float32), rtol=tol, atol=tol,
            err_msg=f"mismatch for shape={shape} dtype={dtype}")

    print("KERNEL_OK")
</pallas_src>

<mosaic_0001>
module attributes {stable_mosaic.version = 11 : i64} {
  func.func @_penc_rows_kernel(%arg0: i32, %arg1: memref<2x8xf32, #tpu.memory_space<vmem>>, %arg2: memref<16x8xf32, #tpu.memory_space<vmem>>) attributes {dimension_semantics = [#tpu.dimension_semantics<parallel>], iteration_bounds = array<i64: 1>, scalar_prefetch = 0 : i64, scratch_operands = 0 : i64, tpu.core_type = #tpu.core_type<tc>, window_params = [{pipeline_mode = #tpu.pipeline_mode<synchronous>, transform_indices = @transform_0, window_bounds = array<i64: 2, 8>}, {transform_indices = @transform_1, window_bounds = array<i64: 16, 8>}]} {
    %c16_i32 = arith.constant 16 : i32
    %0 = arith.muli %arg0, %c16_i32 : i32
    %1 = arith.sitofp %0 : i32 to f32
    %2 = tpu.iota {dimensions = array<i32: 0>} : vector<16x8xi32>
    %3 = arith.sitofp %2 : vector<16x8xi32> to vector<16x8xf32>
    %4 = vector.broadcast %1 : f32 to vector<16x8xf32>
    %5 = arith.addf %4, %3 : vector<16x8xf32>
    %c0 = arith.constant 0 : index
    %c0_0 = arith.constant 0 : index
    %6 = vector.load %arg1[%c0, %c0_0] : memref<2x8xf32, #tpu.memory_space<vmem>>, vector<1x8xf32>
    %7 = vector.broadcast %6 : vector<1x8xf32> to vector<16x8xf32>
    %8 = arith.mulf %5, %7 : vector<16x8xf32>
    %c1 = arith.constant 1 : index
    %c0_1 = arith.constant 0 : index
    %9 = vector.load %arg1[%c1, %c0_1] : memref<2x8xf32, #tpu.memory_space<vmem>>, vector<1x8xf32>
    %10 = vector.broadcast %9 : vector<1x8xf32> to vector<16x8xf32>
    %11 = arith.addf %8, %10 : vector<16x8xf32>
    %12 = math.sin %11 : vector<16x8xf32>
    %c0_2 = arith.constant 0 : index
    %c0_3 = arith.constant 0 : index
    %13 = vector.load %arg2[%c0_2, %c0_3] : memref<16x8xf32, #tpu.memory_space<vmem>>, vector<16x8xf32>
    tpu.vector_store %arg2[%c0_2, %c0_3], %12 {strides = array<i32>} : memref<16x8xf32, #tpu.memory_space<vmem>>, vector<16x8xf32>,
    return
  }
  func.func @transform_0(%arg0: i32) -> (i32, i32) {
    %c0_i32 = arith.constant 0 : i32
    %c0_i32_0 = arith.constant 0 : i32
    %c0_i32_1 = arith.constant 0 : i32
    return %c0_i32, %c0_i32_0 : i32, i32
  }
  func.func @transform_1(%arg0: i32) -> (i32, i32) {
    %c0_i32 = arith.constant 0 : i32
    %c0_i32_0 = arith.constant 0 : i32
    return %arg0, %c0_i32 : i32, i32
  }
}

</mosaic_0001>

<bundles_post_ra>
// kernel: tpu_custom_call.1
= control target key start
LH: loop header
LB: loop body
LE: loop exit
PB: predicated region body
PF: predicated region fallthrough
CT: control target
= control target key end

     0   :  { %6 = vsyncpa [#allocation3], 0  ;;  %s400_s9 = smov [#allocation2]   ;;  %s602_s0 = inlined_call_operand.hbm [shape: f32[2,8], index: 0, kind: input, shape index: {}]   ;;  %s603_s1 = inlined_call_operand.vmem [shape: f32[16,8], index: 1, kind: output, shape index: {}]  }
   0x1   :  { %s12_s8 = sshll.u32 %s602_s0, 4  ;;  %s14_s10 = sshll.u32 %s400_s9, 4  ;;  %s13_s8 = int_to_ptr.hbm [resolvable:$true] %s12_s8  ;;  %s15_s10 = int_to_ptr.vmem [resolvable:$true] %s14_s10 }
   0x2   :  { %17 = dma.hbm_to_vmem [thread:$0]  %s13_s8, 32, %s15_s10, [#allocation3]  }
   0x3   :  { %398 = dma.done.wait [#allocation3], 32  }
   0x4   :  { %399 = vsyncadd [#allocation3], 4294967264  ;;  %v24_v0 = vlaneseq  ;;  %v372_v5 = vld [vmem:[#allocation2] ss:$0 sm:$0xff]  ;;  %v373_v6 = vld [vmem:[#allocation2 + $0x1] ss:$0 sm:$0xff] }
   0x5   :  { %v401_v32 = vmov 683565275   ;;  %v402_v34 = vmov 2475754826   ;;  %v403_v36 = vmov 2131351028  }
   0x6   :  { %v25_v1 = vshrl.u32 %v24_v0, 7  ;;  %v404_v38 = vmov 2102212464   ;;  %v405_v40 = vmov 920167782  }
   0x7   :  { %v406_v49 = vmov 1326507024  }
   0x8   :  { %v26_v2 = vadd.s32 8, %v25_v1  ;;  %v27_v3 = vcvt.s32.f32 %v25_v1 }
   0xa   :  { %v28_v4 = vcvt.s32.f32 %v26_v2  ;;  %v34_v7 = vmul.f32 %v372_v5, %v27_v3 }
   0xc   :  { %v35_v8 = vmul.f32 %v372_v5, %v28_v4  ;;  %v421_v9 = vadd.f32 %v373_v6, %v34_v7 }
   0xe   :  { %v423_v10 = vadd.f32 %v373_v6, %v35_v8  ;;  %v40_v11 = vand.u32 2147483647, %v421_v9  ;;  %v43_v12 = vand.u32 2139095040, %v421_v9 }
  0x10   :  { %v195_v13 = vand.u32 2147483647, %v423_v10  ;;  %v198_v14 = vand.u32 2139095040, %v423_v10  ;;  %v44_v15 = vshrl.u32 %v43_v12, 23  ;;  %v47_v16 = vand.u32 8388607, %v40_v11 }
  0x12   :  { %v199_v17 = vshrl.u32 %v198_v14, 23  ;;  %v358_v18 = vadd.s32 4294967169, %v44_v15  ;;  %v48_v19 = vor.u32 8388608, %v47_v16  ;;  %v202_v21 = vand.u32 8388607, %v195_v13 }
  0x14   :  { %v361_v20 = vadd.s32 4294967169, %v199_v17  ;;  %v50_v22 = vadd.s32 1, %v358_v18  ;;  %v433_v25 = vshll.u32 %v48_v19, 8  ;;  %v203_v26 = vor.u32 8388608, %v202_v21 }
  0x16   :  { %v205_v23 = vadd.s32 1, %v361_v20  ;;  %vm51_vm0 = vcmp.gt.s32.totalorder %v50_v22, 0  ;;  %v89_v42 = vand.u32 65535, %v433_v25  ;;  %v443_v43 = vshll.u32 %v203_v26, 8 }
  0x17   :  { %v52_v24 = vsel %vm51_vm0, %v50_v22, 0  ;;  %v90_v47 = vshrl.u32 %v433_v25, 16 }
  0x18   :  { %vm206_vm1 = vcmp.gt.s32.totalorder %v205_v23, 0  ;;  %v54_v27 = vand.u32 31, %v52_v24  ;;  %v435_v29 = vshrl.u32 %v52_v24, 5 }
  0x19   :  { %v207_v28 = vsel %vm206_vm1, %v205_v23, 0 }
  0x1a   :  { %v437_v30 = vand.u32 31, %v207_v28  ;;  %v55_v31 = vsub.s32 32, %v54_v27  ;;  %v57_v33 = vshll.u32 %v401_v32, %v54_v27  ;;  %v60_v35 = vshll.u32 %v402_v34, %v54_v27 }
  0x1b   :  { %v63_v37 = vshll.u32 %v403_v36, %v54_v27  ;;  %v66_v39 = vshll.u32 %v404_v38, %v54_v27  ;;  %v69_v41 = vshll.u32 %v405_v40, %v54_v27  ;;  %vm72_vm2 = vcmp.lt.s32.totalorder %v435_v29, 1 }
  0x1c   :  { %v58_v44 = vshrl.u32 %v402_v34, %v55_v31  ;;  %v61_v45 = vshrl.u32 %v403_v36, %v55_v31  ;;  %v64_v46 = vshrl.u32 %v404_v38, %v55_v31  ;;  %v67_v48 = vshrl.u32 %v405_v40, %v55_v31 }
  0x1d   :  { %v70_v50 = vshrl.u32 %v406_v49, %v55_v31  ;;  %vm75_vm3 = vcmp.lt.s32.totalorder %v435_v29, 4  ;;  %v452_v54 = vsub.s32 32, %v437_v30  ;;  %v56_v55 = vshrl.u32 %v401_v32, %v55_v31 }
  0x1e   :  { %v59_v51 = vor.u32 %v58_v44, %v57_v33  ;;  %v62_v52 = vor.u32 %v61_v45, %v60_v35  ;;  %v65_v53 = vor.u32 %v64_v46, %v63_v37  ;;  %v68_v56 = vor.u32 %v67_v48, %v66_v39 }
  0x1f   :  { %v71_v57 = vor.u32 %v70_v50, %v69_v41  ;;  %vm74_vm4 = vcmp.lt.s32.totalorder %v435_v29, 3  ;;  %vm73_vm5 = vcmp.lt.s32.totalorder %v435_v29, 2  ;;  %v461_v60 = vshrl.u32 %v207_v28, 5 }
  0x20   :  { %v80_v58 = vsel %vm72_vm2, %v59_v51, %v62_v52  ;;  %v84_v59 = vsel %vm72_vm2, %v62_v52, %v65_v53  ;;  %v81_v61 = vsel %vm75_vm3, %v68_v56, 920167782  ;;  %v212_v63 = vshll.u32 %v401_v32, %v437_v30 }
  0x21   :  { %v85_v62 = vsel %vm75_vm3, %v71_v57, 1326507024  ;;  %v215_v0 = vshll.u32 %v402_v34, %v437_v30  ;;  %v77_v1 = vsel %vm75_vm3, %v65_v53, 2102212464  ;;  %v82_v2 = vsel %vm74_vm4, %v65_v53, %v81_v61 }
  0x22   :  { %v86_v3 = vsel %vm74_vm4, %v68_v56, %v85_v62  ;;  %v213_v4 = vshrl.u32 %v402_v34, %v452_v54  ;;  %v76_v5 = vsel %vm72_vm2, %v56_v55, %v59_v51  ;;  %v83_v6 = vsel %vm73_vm5, %v80_v58, %v82_v2 }
  0x23   :  { %v87_v7 = vsel %vm73_vm5, %v84_v59, %v86_v3  ;;  %v216_v8 = vshrl.u32 %v403_v36, %v452_v54  ;;  %v113_v15 = vand.u32 65535, %v83_v6  ;;  %v114_v16 = vshrl.u32 %v83_v6, 16 }
  0x24   :  { %v91_v12 = vand.u32 65535, %v87_v7  ;;  %v92_v14 = vshrl.u32 %v87_v7, 16  ;;  %v78_v17 = vsel %vm74_vm4, %v62_v52, %v77_v1  ;;  %v486_v18 = vor.u32 %v213_v4, %v212_v63 }
  0x25   :  { %v488_v19 = vor.u32 %v216_v8, %v215_v0  ;;  %v218_v20 = vshll.u32 %v403_v36, %v437_v30  ;;  %v219_v24 = vshrl.u32 %v404_v38, %v452_v54  ;;  %v115_v27 = vmul.u32 %v113_v15, %v89_v42 }
  0x26   :  { %v93_v21 = vmul.u32 %v91_v12, %v89_v42  ;;  %v94_v22 = vmul.u32 %v92_v14, %v89_v42  ;;  %v95_v23 = vmul.u32 %v91_v12, %v90_v47  ;;  %v96_v26 = vmul.u32 %v92_v14, %v90_v47 }
  0x27   :  { %v116_v28 = vmul.u32 %v114_v16, %v89_v42  ;;  %v117_v31 = vmul.u32 %v113_v15, %v90_v47  ;;  %v118_v37 = vmul.u32 %v114_v16, %v90_v47  ;;  %v221_v48 = vshll.u32 %v404_v38, %v437_v30 }
  0x28   :  { %v97_v33 = vshll.u32 %v94_v22, 16  ;;  %v98_v34 = vshrl.u32 %v94_v22, 16  ;;  %v99_v35 = vshll.u32 %v95_v23, 16  ;;  %v100_v39 = vshrl.u32 %v95_v23, 16 }
  0x29   :  { %v119_v41 = vshll.u32 %v116_v28, 16  ;;  %v120_v44 = vshrl.u32 %v116_v28, 16  ;;  %v121_v45 = vshll.u32 %v117_v31, 16  ;;  %v122_v46 = vshrl.u32 %v117_v31, 16 }
  0x2a   :  { %vm101_vm6 = vc.u32 %v93_v21, %v97_v33  ;;  %v103_v36 = vadd.s32 %v97_v33, %v93_v21  ;;  %v407_v50 = vmov 0   ;;  %v222_v52 = vshrl.u32 %v405_v40, %v452_v54 }
  0x2b   :  { %v102_v51 = vsel %vm101_vm6, 1, %v407_v50  ;;  %vm123_vm7 = vc.u32 %v115_v27, %v119_v41  ;;  %v125_v42 = vadd.s32 %v119_v41, %v115_v27  ;;  %v224_v55 = vshll.u32 %v405_v40, %v437_v30 }
  0x2c   :  { %v104_v53 = vadd.s32 %v102_v51, %v96_v26  ;;  %vm105_vm8 = vc.u32 %v103_v36, %v99_v35  ;;  %v124_v47 = vsel %vm123_vm7, 1, %v407_v50  ;;  %v220_v38 = vor.u32 %v219_v24, %v218_v20 }
  0x2d   :  { %v106_v56 = vsel %vm105_vm8, 1, %v407_v50  ;;  %v126_v57 = vadd.s32 %v124_v47, %v118_v37  ;;  %vm127_vm9 = vc.u32 %v125_v42, %v121_v45  ;;  %v223_v61 = vor.u32 %v222_v52, %v221_v48 }
  0x2e   :  { %v108_v58 = vadd.s32 %v106_v56, %v104_v53  ;;  %v128_v59 = vsel %vm127_vm9, 1, %v407_v50  ;;  %v225_v62 = vshrl.u32 %v406_v49, %v452_v54  ;;  %v505_v63 = vadd.s32 %v125_v42, %v121_v45 }
  0x2f   :  { %v130_v0 = vadd.s32 %v128_v59, %v126_v57  ;;  %vm227_vm10 = vcmp.lt.s32.totalorder %v461_v60, 1  ;;  %vm229_vm11 = vcmp.lt.s32.totalorder %v461_v60, 3  ;;  %vm228_vm12 = vcmp.lt.s32.totalorder %v461_v60, 2 }
  0x30   :  { %v109_v30 = vadd.s32 %v108_v58, %v98_v34  ;;  %v226_v40 = vor.u32 %v225_v62, %v224_v55  ;;  %vm230_vm13 = vcmp.lt.s32.totalorder %v461_v60, 4  ;;  %v79_v1 = vsel %vm73_vm5, %v76_v5, %v78_v17 }
  0x31   :  { %v131_v2 = vadd.s32 %v130_v0, %v120_v44  ;;  %v235_v49 = vsel %vm227_vm10, %v486_v18, %v488_v19  ;;  %v236_v3 = vsel %vm230_vm13, %v223_v61, 920167782  ;;  %v239_v7 = vsel %vm227_vm10, %v488_v19, %v220_v38 }
  0x32   :  { %v519_v4 = vadd.s32 %v109_v30, %v100_v39  ;;  %v237_v6 = vsel %vm229_vm11, %v220_v38, %v236_v3  ;;  %v244_v29 = vand.u32 65535, %v443_v43  ;;  %v240_v12 = vsel %vm230_vm13, %v226_v40, 1326507024 }
  0x33   :  { %v132_v5 = vadd.s32 %v131_v2, %v122_v46  ;;  %v238_v8 = vsel %vm228_vm12, %v235_v49, %v237_v6  ;;  %v245_v14 = vshrl.u32 %v443_v43, 16  ;;  %v133_v15 = vmul.u32 %v433_v25, %v79_v1 }
  0x34   :  { %vm135_vm14 = vc.u32 %v519_v4, %v505_v63  ;;  %v241_v16 = vsel %vm229_vm11, %v223_v61, %v240_v12  ;;  %v268_v17 = vand.u32 65535, %v238_v8  ;;  %v269_v22 = vshrl.u32 %v238_v8, 16 }
  0x35   :  { %v136_v20 = vadd.s32 1, %v132_v5  ;;  %v242_v21 = vsel %vm228_vm12, %v239_v7, %v241_v16  ;;  %v211_v27 = vshrl.u32 %v401_v32, %v452_v54  ;;  %v232_v44 = vsel %vm230_vm13, %v220_v38, 2102212464 }
  0x36   :  { %v246_v23 = vand.u32 65535, %v242_v21  ;;  %v247_v24 = vshrl.u32 %v242_v21, 16  ;;  %v271_v28 = vmul.u32 %v269_v22, %v244_v29  ;;  %v272_v25 = vmul.u32 %v268_v17, %v245_v14 }
  0x37   :  { %v137_v26 = vsel %vm135_vm14, %v136_v20, %v132_v5  ;;  %v270_v35 = vmul.u32 %v268_v17, %v244_v29  ;;  %v231_v46 = vsel %vm227_vm10, %v211_v27, %v486_v18  ;;  %v273_v32 = vmul.u32 %v269_v22, %v245_v14 }
  0x38   :  { %v138_v31 = vadd.s32 %v137_v26, %v133_v15  ;;  %v248_v33 = vmul.u32 %v246_v23, %v244_v29  ;;  %v249_v34 = vmul.u32 %v247_v24, %v244_v29  ;;  %v250_v37 = vmul.u32 %v246_v23, %v245_v14 }
  0x39   :  { %v274_v39 = vshll.u32 %v271_v28, 16  ;;  %v251_v45 = vmul.u32 %v247_v24, %v245_v14  ;;  %v276_v54 = vshll.u32 %v272_v25, 16  ;;  %v233_v52 = vsel %vm229_vm11, %v488_v19, %v232_v44 }
  0x3a   :  { %v139_v41 = vadd.s32 536870912, %v138_v31  ;;  %v252_v36 = vshll.u32 %v249_v34, 16  ;;  %v254_v48 = vshll.u32 %v250_v37, 16  ;;  %v253_v18 = vshrl.u32 %v249_v34, 16 }
  0x3b   :  { %vm278_vm0 = vc.u32 %v270_v35, %v274_v39  ;;  %v280_v55 = vadd.s32 %v274_v39, %v270_v35  ;;  %v275_v58 = vshrl.u32 %v271_v28, 16  ;;  %v255_v62 = vshrl.u32 %v250_v37, 16 }
  0x3c   :  { %v546_v51 = vshrl.u32 %v139_v41, 30  ;;  %vm256_vm15 = vc.u32 %v248_v33, %v252_v36  ;;  %v258_v42 = vadd.s32 %v252_v36, %v248_v33  ;;  %v279_v47 = vsel %vm278_vm0, 1, %v407_v50 }
  0x3d   :  { %v257_v53 = vsel %vm256_vm15, 1, %v407_v50  ;;  %v281_v59 = vadd.s32 %v279_v47, %v273_v32  ;;  %vm282_vm2 = vc.u32 %v280_v55, %v276_v54  ;;  %v277_v30 = vshrl.u32 %v272_v25, 16 }
  0x3e   :  { %v141_v56 = vshll.u32 %v546_v51, 30  ;;  %v259_v57 = vadd.s32 %v257_v53, %v251_v45  ;;  %vm260_vm1 = vc.u32 %v258_v42, %v254_v48  ;;  %v283_v19 = vsel %vm282_vm2, 1, %v407_v50 }
  0x3f   :  { %v261_v38 = vsel %vm260_vm1, 1, %v407_v50  ;;  %v285_v40 = vadd.s32 %v283_v19, %v281_v59  ;;  %v284_v49 = vadd.s32 %v280_v55, %v276_v54  ;;  %v234_v3 = vsel %vm228_vm12, %v231_v46, %v233_v52 }
  0x40   :  { %v142_v61 = vsub.s32 %v138_v31, %v141_v56  ;;  %v263_v0 = vadd.s32 %v261_v38, %v259_v57  ;;  %v288_v12 = vmul.u32 %v443_v43, %v234_v3  ;;  %v134_v50 = vadd.s32 %v505_v63, %v519_v4 }
  0x41   :  { %v286_v6 = vadd.s32 %v285_v40, %v275_v58  ;;  %v164_v37 = vsub.s32 4, %v546_v51  ;;  %vm42_vm7 = vcmp.lt.s32.totalorder %v421_v9, 0  ;;  %vm568_vm8 = vcmp.le.f32.partialorder %v40_v11, 0.7853982 }
  0x42   :  { %vm143_vm3 = vcmp.lt.s32.totalorder %v142_v61, 0  ;;  %v144_v1 = vsub.s32 0, %v142_v61  ;;  %v264_v2 = vadd.s32 %v263_v0, %v253_v18  ;;  %vm197_vm11 = vcmp.lt.s32.totalorder %v423_v10, 0 }
  0x43   :  { %v287_v8 = vadd.s32 %v286_v6, %v277_v30  ;;  %v165_v46 = vsel %vm42_vm7, %v164_v37, %v546_v51  ;;  %vm582_vm13 = vcmp.le.f32.partialorder %v195_v13, 0.7853982  ;;  %vm183_vm15 = vweird.f32 %v421_v9 }
  0x44   :  { %v145_v7 = vsel %vm143_vm3, %v144_v1, %v142_v61  ;;  %v265_v29 = vadd.s32 %v264_v2, %v255_v62  ;;  %v167_v52 = vsel %vm568_vm8, 0, %v165_v46  ;;  %vm350_vm0 = vcmask 64512  }
  0x45   :  { %v146_v5 = vclz %v145_v7  ;;  %v291_v15 = vadd.s32 1, %v287_v8  ;;  %v184_v58 = vadd.s32 3, %v167_v52 }
  0x46   :  { %vm290_vm4 = vc.u32 %v265_v29, %v284_v49  ;;  %v289_v42 = vadd.s32 %v284_v49, %v265_v29 }
  0x47   :  { %v359_v14 = vadd.s32 4294967294, %v146_v5  ;;  %v292_v16 = vsel %vm290_vm4, %v291_v15, %v287_v8  ;;  %v185_v1 = vand.u32 3, %v184_v58  ;;  %vm338_vm4 = vweird.f32 %v423_v10 }
  0x48   :  { %v293_v20 = vadd.s32 %v292_v16, %v288_v12 }
  0x49   :  { %vm360_vm5 = vcmp.lt.s32.totalorder %v359_v14, 0  ;;  %vm190_vm10 = vcmp.eq.s32.totalorder %v185_v1, 2  ;;  %vm187_vm12 = vcmp.eq.s32.totalorder %v185_v1, 0  ;;  %vm186_vm14 = vcmp.lt.s32.totalorder %v185_v1, 2 }
  0x4a   :  { %v149_v17 = vsel %vm360_vm5, 0, %v359_v14  ;;  %v294_v23 = vadd.s32 536870912, %v293_v20 }
  0x4b   :  { %v150_v21 = vsub.s32 32, %v149_v17  ;;  %v151_v60 = vshll.u32 %v142_v61, %v149_v17  ;;  %v154_v22 = vsub.s32 4294967266, %v149_v17 }
  0x4c   :  { %v561_v27 = vshrl.u32 %v294_v23, 30 }
  0x4d   :  { %v152_v24 = vshrl.u32 %v134_v50, %v150_v21  ;;  %v155_v26 = vadd.s32 127, %v154_v22 }
  0x4e   :  { %v296_v25 = vshll.u32 %v561_v27, 30  ;;  %v319_v15 = vsub.s32 4, %v561_v27 }
  0x4f   :  { %v153_v28 = vor.u32 %v152_v24, %v151_v60  ;;  %v156_v43 = vshll.u32 %v155_v26, 23 }
  0x50   :  { %v297_v34 = vsub.s32 %v293_v20, %v296_v25  ;;  %v320_v22 = vsel %vm197_vm11, %v319_v15, %v561_v27 }
  0x51   :  { %v157_v31 = vor.u32 4788187, %v156_v43  ;;  %v160_v33 = vcvt.s32.f32 %v153_v28  ;;  %v322_v28 = vsel %vm582_vm13, 0, %v320_v22 }
  0x52   :  { %vm298_vm6 = vcmp.lt.s32.totalorder %v297_v34, 0  ;;  %v299_v4 = vsub.s32 0, %v297_v34 }
  0x53   :  { %v158_v63 = vand.u32 2147483647, %v157_v31  ;;  %v339_v31 = vadd.s32 3, %v322_v28 }
  0x54   :  { %v300_v39 = vsel %vm298_vm6, %v299_v4, %v297_v34 }
  0x55   :  { %v161_v35 = vmul.f32 %v160_v33, %v158_v63  ;;  %v301_v45 = vclz %v300_v39 }
  0x57   :  { %v162_v44 = vxor.u32 2147483648, %v161_v35  ;;  %v362_v48 = vadd.s32 4294967294, %v301_v45 }
  0x59   :  { %v163_v36 = vsel %vm42_vm7, %v162_v44, %v161_v35  ;;  %vm363_vm9 = vcmp.lt.s32.totalorder %v362_v48, 0  ;;  %v340_v35 = vand.u32 3, %v339_v31 }
  0x5a   :  { %v166_v32 = vsel %vm568_vm8, %v421_v9, %v163_v36  ;;  %v304_v11 = vsel %vm363_vm9, 0, %v362_v48 }
  0x5b   :  { %v168_v54 = vmul.f32 %v166_v32, %v166_v32  ;;  %v305_v55 = vsub.s32 32, %v304_v11  ;;  %v306_v56 = vshll.u32 %v297_v34, %v304_v11  ;;  %v309_v18 = vsub.s32 4294967266, %v304_v11 }
  0x5c   :  { %vm345_vm1 = vcmp.eq.s32.totalorder %v340_v35, 2  ;;  %vm342_vm2 = vcmp.eq.s32.totalorder %v340_v35, 0  ;;  %vm341_vm3 = vcmp.lt.s32.totalorder %v340_v35, 2 }
  0x5d   :  { %v169_v53 = vmul.f32 -0.001358992, %v168_v54  ;;  %v176_v47 = vmul.f32 -0.00019511016, %v168_v54  ;;  %v307_v51 = vshrl.u32 %v289_v42, %v305_v55  ;;  %v310_v59 = vadd.s32 127, %v309_v18 }
  0x5f   :  { %v170_v57 = vadd.f32 0.041655596, %v169_v53  ;;  %v177_v38 = vadd.f32 0.008332121, %v176_v47  ;;  %v308_v0 = vor.u32 %v307_v51, %v306_v56  ;;  %v311_v19 = vshll.u32 %v310_v59, 23 }
  0x61   :  { %v171_v61 = vmul.f32 %v170_v57, %v168_v54  ;;  %v178_v62 = vmul.f32 %v177_v38, %v168_v54  ;;  %v312_v2 = vor.u32 4788187, %v311_v19  ;;  %v315_v49 = vcvt.s32.f32 %v308_v0 }
  0x63   :  { %v172_v30 = vadd.f32 -0.4999988, %v171_v61  ;;  %v179_v40 = vadd.f32 -0.16666654, %v178_v62  ;;  %v313_v7 = vand.u32 2147483647, %v312_v2 }
  0x65   :  { %v173_v3 = vmul.f32 %v172_v30, %v168_v54  ;;  %v180_v6 = vmul.f32 %v179_v40, %v168_v54  ;;  %v316_v8 = vmul.f32 %v315_v49, %v313_v7 }
  0x67   :  { %v174_v29 = vadd.f32 1.0, %v173_v3  ;;  %v181_v5 = vadd.f32 1.0, %v180_v6  ;;  %v317_v16 = vxor.u32 2147483648, %v316_v8 }
  0x69   :  { %v182_v12 = vmul.f32 %v181_v5, %v166_v32  ;;  %v191_v14 = vxor.u32 2147483648, %v174_v29  ;;  %v318_v21 = vsel %vm197_vm11, %v317_v16, %v316_v8 }
  0x6a   :  { %v321_v23 = vsel %vm582_vm13, %v423_v10, %v318_v21 }
  0x6b   :  { %v188_v17 = vxor.u32 2147483648, %v182_v12  ;;  %v192_v20 = vsel %vm190_vm10, %v191_v14, %v182_v12  ;;  %v323_v13 = vmul.f32 %v321_v23, %v321_v23 }
  0x6d   :  { %v189_v60 = vsel %vm187_vm12, %v174_v29, %v188_v17  ;;  %v324_v43 = vmul.f32 -0.001358992, %v323_v13  ;;  %v331_v25 = vmul.f32 -0.00019511016, %v323_v13 }
  0x6e   :  { %v193_v24 = vsel %vm186_vm14, %v189_v60, %v192_v20 }
  0x6f   :  { %v194_v26 = vsel %vm183_vm15, nan, %v193_v24  ;;  %v325_v9 = vadd.f32 0.041655596, %v324_v43  ;;  %v332_v27 = vadd.f32 0.008332121, %v331_v25 }
  0x70   :  { %351 = vst.msk [vmem:[%s603_s1] sm:$0xff] %vm350_vm0, %v194_v26 }
  0x71   :  { %v326_v33 = vmul.f32 %v325_v9, %v323_v13  ;;  %v333_v34 = vmul.f32 %v332_v27, %v323_v13 }
  0x73   :  { %v327_v63 = vadd.f32 -0.4999988, %v326_v33  ;;  %v334_v4 = vadd.f32 -0.16666654, %v333_v34 }
  0x75   :  { %v328_v37 = vmul.f32 %v327_v63, %v323_v13  ;;  %v335_v39 = vmul.f32 %v334_v4, %v323_v13 }
  0x77   :  { %v329_v41 = vadd.f32 1.0, %v328_v37  ;;  %v336_v44 = vadd.f32 1.0, %v335_v39 }
  0x79   :  { %v337_v45 = vmul.f32 %v336_v44, %v321_v23  ;;  %v346_v36 = vxor.u32 2147483648, %v329_v41 }
  0x7b   :  { %v343_v46 = vxor.u32 2147483648, %v337_v45  ;;  %v347_v48 = vsel %vm345_vm1, %v346_v36, %v337_v45 }
  0x7d   :  { %v344_v32 = vsel %vm342_vm2, %v329_v41, %v343_v46 }
  0x7e   :  { %v348_v54 = vsel %vm341_vm3, %v344_v32, %v347_v48 }
  0x7f   :  { %v349_v42 = vsel %vm338_vm4, nan, %v348_v54 }
  0x80   :  { %352 = vst.msk [vmem:[%s603_s1 + $0x8] sm:$0xff] %vm350_vm0, %v349_v42 }
  0x81   :  { %357 = vsyncpa [#allocation3], 1 }

</bundles_post_ra>
